<compile_context>
chip_gen: v7x
topology: tpu7x:2x2x1
jax: 0.10.0
libtpu: 0.0.40
codegen_flags: <defaults>
</compile_context>

<pallas_src>
import numpy as np
import jax
import jax.numpy as jnp
from jax.experimental import pallas as pl
from jax.experimental.pallas import tpu as pltpu


# ---------------------------------------------------------------------------
# helpers: tile selection + generation-aware VMEM limit
# ---------------------------------------------------------------------------
def _tile(dim, target, align):
    """Largest aligned divisor of `dim` that is <= target, else full dim."""
    if dim <= target:
        return dim
    t = (target // align) * align
    while t >= align:
        if dim % t == 0:
            return t
        t -= align
    return dim  # fall back to full extent (still a legal block)


def _vmem_capacity_bytes():
    try:
        return int(pltpu.get_tpu_info().vmem_capacity_bytes)
    except Exception:
        return 64 << 20   # conservative fallback (v7x-sized)


def _vmem_limit_bytes(need_bytes):
    # leave ~16 MiB headroom below the physical VMEM of this generation
    # (v7x: ~48 MiB usable; v5e/v6e: ~112 MiB usable).
    cap = max(_vmem_capacity_bytes() - (16 << 20), 32 << 20)
    return int(min(cap, max(need_bytes + (4 << 20), 32 << 20)))


# ---------------------------------------------------------------------------
# Kernel 1: fused head-major projection(s)
#   x (M, K) f32  @  W_j (H, K, d_j) bf16  ->  out_j (H, M, d_j) bf16
#   One pallas_call can produce several projections (QKV or KV fused) so the
#   activations are read from HBM exactly once.
# ---------------------------------------------------------------------------
def _make_proj_kernel(n_out, n_head):
    def kernel(*refs):
        x_ref = refs[0]
        w_refs = refs[1:1 + n_out]
        o_refs = refs[1 + n_out:1 + 2 * n_out]
        acc_refs = refs[1 + 2 * n_out:]
        kk = pl.program_id(1)

        @pl.when(kk == 0)
        def _init():
            for acc in acc_refs:
                acc[...] = jnp.zeros_like(acc)

        x = x_ref[...].astype(jnp.bfloat16)        # activations -> bf16, f32 acc
        for w_ref, acc in zip(w_refs, acc_refs):
            for h in range(n_head):                # leading-dim index: no lane slicing
                acc[h] += jnp.dot(x, w_ref[h],
                                  preferred_element_type=jnp.float32)

        @pl.when(kk == pl.num_programs(1) - 1)
        def _store():
            for o_ref, acc in zip(o_refs, acc_refs):
                o_ref[...] = acc[...].astype(o_ref.dtype)

    return kernel


def projection_heads(x2d, weights):
    """x2d: (M, K) f32; weights: list of (H, K, d_j) bf16 head-major weights.
       Returns list of (H, M, d_j) bf16 head-major projections."""
    M, K = x2d.shape
    H = weights[0].shape[0]
    dims = [int(w.shape[2]) for w in weights]
    n_out = len(weights)

    tm = _tile(M, 512, 8)
    tk = _tile(K, 512, 128)
    grid = (M // tm, K // tk)

    in_specs = [pl.BlockSpec((tm, tk), lambda i, k: (i, k))]
    out_specs = []
    out_shape = []
    scratch = []
    need = 2 * tm * tk * x2d.dtype.itemsize
    for w in weights:
        d = int(w.shape[2])
        in_specs.append(pl.BlockSpec((H, tk, d), lambda i, k: (0, k, 0)))
        out_specs.append(pl.BlockSpec((H, tm, d), lambda i, k: (0, i, 0)))
        out_shape.append(jax.ShapeDtypeStruct((H, M, d), jnp.bfloat16))
        scratch.append(pltpu.VMEM((H, tm, d), jnp.float32))
        need += 2 * H * tk * d * 2 + 2 * H * tm * d * 2 + H * tm * d * 4

    outs = pl.pallas_call(
        _make_proj_kernel(n_out, H),
        out_shape=tuple(out_shape),
        grid=grid,
        in_specs=in_specs,
        out_specs=tuple(out_specs),
        scratch_shapes=scratch,
        compiler_params=pltpu.CompilerParams(
            dimension_semantics=("parallel", "arbitrary"),
            vmem_limit_bytes=_vmem_limit_bytes(need)),
        cost_estimate=pl.CostEstimate(
            flops=2 * M * K * H * sum(dims),
            transcendentals=0,
            bytes_accessed=(M * K * x2d.dtype.itemsize
                            + sum(H * K * d * 2 for d in dims)
                            + sum(H * M * d * 2 for d in dims))),
    )(x2d, *weights)
    return list(outs)


# ---------------------------------------------------------------------------
# Kernel 2: flash-style scaled dot-product attention (head-major)
#   grid = (batch, head, q-tile, kv-tile); kv axis is the online-softmax
#   reduction ("arbitrary"), m/l/acc live in VMEM scratch.
# ---------------------------------------------------------------------------
def _flash_attn_kernel(q_ref, k_ref, v_ref, o_ref, m_sc, l_sc, acc_sc):
    kv = pl.program_id(3)

    @pl.when(kv == 0)
    def _init():
        m_sc[...] = jnp.full_like(m_sc, -jnp.inf)
        l_sc[...] = jnp.zeros_like(l_sc)
        acc_sc[...] = jnp.zeros_like(acc_sc)

    q = q_ref[0]                                   # (tq, d_k)  bf16 (1/temp folded in W_q)
    k = k_ref[0]                                   # (tkv, d_k) bf16
    v = v_ref[0]                                   # (tkv, d_v) bf16
    # QK^T without materializing k.T: contract the last dim of both operands.
    s = jax.lax.dot_general(q, k, (((1,), (1,)), ((), ())),
                            preferred_element_type=jnp.float32)   # (tq, tkv) f32

    m_prev = m_sc[...]
    m_new = jnp.maximum(m_prev, jnp.max(s, axis=-1, keepdims=True))
    alpha = jnp.exp(m_prev - m_new)
    p = jnp.exp(s - m_new)                                         # f32 softmax stats
    l_sc[...] = alpha * l_sc[...] + jnp.sum(p, axis=-1, keepdims=True)
    acc_sc[...] = alpha * acc_sc[...] + jnp.dot(
        p.astype(v.dtype), v, preferred_element_type=jnp.float32)
    m_sc[...] = m_new
    # (dropout on the attention weights is identity in eval mode)

    @pl.when(kv == pl.num_programs(3) - 1)
    def _store():
        o_ref[0] = (acc_sc[...] * pl.reciprocal(l_sc[...], approx=True)
                    ).astype(o_ref.dtype)


def flash_attention(qh, kh, vh, sz_b, len_q, len_k):
    """qh: (H, B*Lq, d_k), kh: (H, B*Lk, d_k), vh: (H, B*Lk, d_v) bf16 head-major.
       Returns (H, B*Lq, d_v) bf16."""
    H, Mq, d_k = qh.shape
    _, Mk, d_v = vh.shape
    tq = _tile(len_q, 512, 8)
    tkv = _tile(len_k, 512, 8)
    n_q = len_q // tq
    n_kv = len_k // tkv
    grid = (sz_b, H, n_q, n_kv)

    need = (2 * (tq * d_k + tkv * d_k + tkv * d_v + tq * d_v) * 2
            + (tq * d_v + 2 * tq) * 4)

    return pl.pallas_call(
        _flash_attn_kernel,
        out_shape=jax.ShapeDtypeStruct((H, Mq, d_v), jnp.bfloat16),
        grid=grid,
        in_specs=[
            pl.BlockSpec((1, tq, d_k), lambda b, h, qi, ki: (h, b * n_q + qi, 0)),
            pl.BlockSpec((1, tkv, d_k), lambda b, h, qi, ki: (h, b * n_kv + ki, 0)),
            pl.BlockSpec((1, tkv, d_v), lambda b, h, qi, ki: (h, b * n_kv + ki, 0)),
        ],
        out_specs=pl.BlockSpec((1, tq, d_v),
                               lambda b, h, qi, ki: (h, b * n_q + qi, 0)),
        scratch_shapes=[pltpu.VMEM((tq, 1), jnp.float32),
                        pltpu.VMEM((tq, 1), jnp.float32),
                        pltpu.VMEM((tq, d_v), jnp.float32)],
        compiler_params=pltpu.CompilerParams(
            dimension_semantics=("parallel", "parallel", "parallel", "arbitrary"),
            vmem_limit_bytes=_vmem_limit_bytes(need)),
        cost_estimate=pl.CostEstimate(
            flops=2 * sz_b * H * len_q * len_k * (d_k + d_v),
            transcendentals=sz_b * H * len_q * len_k,
            bytes_accessed=(qh.size + kh.size + vh.size) * 2 + H * Mq * d_v * 2),
    )(qh, kh, vh)


# ---------------------------------------------------------------------------
# Kernel 3: fc as a head reduction + bias + residual + LayerNorm (fused)
#   out = LayerNorm( sum_h A[h] @ W_fc[h] + b + residual )
# ---------------------------------------------------------------------------
def _fc_residual_ln_kernel(a_ref, w_ref, b_ref, res_ref, g_ref, beta_ref,
                           o_ref, acc_ref):
    h = pl.program_id(1)

    @pl.when(h == 0)
    def _init():
        acc_ref[...] = jnp.zeros_like(acc_ref)

    acc_ref[...] += jnp.dot(a_ref[0], w_ref[0],
                            preferred_element_type=jnp.float32)

    @pl.when(h == pl.num_programs(1) - 1)
    def _finalize():
        y = acc_ref[...] + b_ref[...]        # bias (1, D) broadcast, f32
        # (dropout on the fc output is identity in eval mode)
        y = y + res_ref[...]                 # residual, f32
        mean = jnp.mean(y, axis=-1, keepdims=True)
        var = jnp.mean(jnp.square(y - mean), axis=-1, keepdims=True)
        yhat = (y - mean) * jax.lax.rsqrt(var + 1e-5)
        o_ref[...] = (yhat * g_ref[...] + beta_ref[...]).astype(o_ref.dtype)


def fc_residual_layernorm(a_hmd, w_hdD, b, res2d, gamma, beta):
    """a_hmd: (H, M, d_v) bf16; w_hdD: (H, d_v, D) bf16; b/gamma/beta: (1, D) f32;
       res2d: (M, D) f32.  Returns (M, D) f32."""
    H, M, d_v = a_hmd.shape
    D = int(w_hdD.shape[2])
    tm = _tile(M, 512, 8)
    grid = (M // tm, H)

    need = (2 * tm * d_v * 2 + 2 * d_v * D * 2 + 2 * tm * D * 4
            + 2 * tm * D * 4 + tm * D * 4 + 6 * D * 4)

    return pl.pallas_call(
        _fc_residual_ln_kernel,
        out_shape=jax.ShapeDtypeStruct((M, D), jnp.float32),
        grid=grid,
        in_specs=[pl.BlockSpec((1, tm, d_v), lambda i, h: (h, i, 0)),
                  pl.BlockSpec((1, d_v, D), lambda i, h: (h, 0, 0)),
                  pl.BlockSpec((1, D), lambda i, h: (0, 0)),
                  pl.BlockSpec((tm, D), lambda i, h: (i, 0)),
                  pl.BlockSpec((1, D), lambda i, h: (0, 0)),
                  pl.BlockSpec((1, D), lambda i, h: (0, 0))],
        out_specs=pl.BlockSpec((tm, D), lambda i, h: (i, 0)),
        scratch_shapes=[pltpu.VMEM((tm, D), jnp.float32)],
        compiler_params=pltpu.CompilerParams(
            dimension_semantics=("parallel", "arbitrary"),
            vmem_limit_bytes=_vmem_limit_bytes(need)),
        cost_estimate=pl.CostEstimate(
            flops=2 * M * H * d_v * D + 10 * M * D,
            transcendentals=M,
            bytes_accessed=(H * M * d_v * 2 + H * d_v * D * 2
                            + 2 * M * D * 4 + 3 * D * 4)),
    )(a_hmd, w_hdD, b, res2d, gamma, beta)


# ---------------------------------------------------------------------------
# Module: parameters + forward glue
# ---------------------------------------------------------------------------
class MultiHeadAttentionPallas:
    def __init__(self, n_head, d_model, d_k, d_v, key):
        self.n_head, self.d_model, self.d_k, self.d_v = n_head, d_model, d_k, d_v
        k1, k2, k3, k4, k5 = jax.random.split(key, 5)

        std_qk = np.sqrt(2.0 / (d_model + d_k))
        std_v = np.sqrt(2.0 / (d_model + d_v))
        temperature = float(np.power(d_k, 0.5))

        # torch weight shapes: (n_head*d_k|d_v, d_model).  Stored head-major
        # (H, d_model, d) in bf16 so the MXU consumes them directly.
        w_qs = jax.random.normal(k1, (n_head * d_k, d_model), jnp.float32) * std_qk
        w_ks = jax.random.normal(k2, (n_head * d_k, d_model), jnp.float32) * std_qk
        w_vs = jax.random.normal(k3, (n_head * d_v, d_model), jnp.float32) * std_v
        # fold 1/temperature into the Q weights at f32 precision (review item)
        w_qs = w_qs / temperature

        def to_head_major(w, d):
            # (H*d, d_model) -> (H, d_model, d) bf16
            return jnp.transpose(w.reshape(n_head, d, d_model),
                                 (0, 2, 1)).astype(jnp.bfloat16)

        self.w_q = to_head_major(w_qs, d_k)
        self.w_k = to_head_major(w_ks, d_k)
        self.w_v = to_head_major(w_vs, d_v)

        # fc: xavier normal, torch weight shape (d_model, n_head*d_v);
        # stored head-major (H, d_v, d_model) bf16 for the head-reduction kernel.
        std_fc = np.sqrt(2.0 / (n_head * d_v + d_model))
        fc_w = jax.random.normal(k4, (d_model, n_head * d_v), jnp.float32) * std_fc
        self.fc_w = fc_w.T.reshape(n_head, d_v, d_model).astype(jnp.bfloat16)
        bound = 1.0 / np.sqrt(n_head * d_v)
        self.fc_b = jax.random.uniform(k5, (1, d_model), jnp.float32,
                                       minval=-bound, maxval=bound)

        # LayerNorm affine params (default init), kept in f32
        self.ln_gamma = jnp.ones((1, d_model), jnp.float32)
        self.ln_beta = jnp.zeros((1, d_model), jnp.float32)

    def __call__(self, q, k, v):
        d_model = self.d_model
        sz_b, len_q, _ = q.shape
        _, len_k, _ = k.shape
        _, len_v, _ = v.shape
        assert len_k == len_v
        residual = q

        xq = q.reshape(sz_b * len_q, d_model)
        if (q is k) and (k is v):
            # self-attention: single fused QKV projection (x read once)
            qh, kh, vh = projection_heads(xq, [self.w_q, self.w_k, self.w_v])
        elif k is v:
            # cross-attention with shared K/V source: fused KV projection
            (qh,) = projection_heads(xq, [self.w_q])
            kh, vh = projection_heads(k.reshape(sz_b * len_k, d_model),
                                      [self.w_k, self.w_v])
        else:
            (qh,) = projection_heads(xq, [self.w_q])
            (kh,) = projection_heads(k.reshape(sz_b * len_k, d_model), [self.w_k])
            (vh,) = projection_heads(v.reshape(sz_b * len_v, d_model), [self.w_v])

        # flash attention over head-major tensors -> (H, B*Lq, d_v)
        oh = flash_attention(qh, kh, vh, sz_b, len_q, len_k)

        # fused fc (head reduction) + bias + residual + layernorm
        out2d = fc_residual_layernorm(
            oh, self.fc_w, self.fc_b,
            residual.reshape(sz_b * len_q, d_model).astype(jnp.float32),
            self.ln_gamma, self.ln_beta)
        return out2d.reshape(sz_b, len_q, d_model)


if __name__ == "__main__":
    n_head, d_model, d_k, d_v = 2, 32, 16, 16
    sz_b, seq = 2, 8

    key = jax.random.PRNGKey(0)
    k_param, kq, kk, kv = jax.random.split(key, 4)

    mha = MultiHeadAttentionPallas(n_head, d_model, d_k, d_v, k_param)

    q = jax.random.normal(kq, (sz_b, seq, d_model), jnp.float32)
    k = jax.random.normal(kk, (sz_b, seq, d_model), jnp.float32)
    v = jax.random.normal(kv, (sz_b, seq, d_model), jnp.float32)

    out = mha(q, k, v)        # cross-attention (three separate projections)
    out_kv = mha(q, k, k)     # shared-KV path (fused KV projection)
    out_self = mha(q, q, q)   # self-attention path (fused QKV projection)
    jax.block_until_ready((out, out_kv, out_self))

    assert out.shape == (sz_b, seq, d_model)
    assert out_kv.shape == (sz_b, seq, d_model)
    assert out_self.shape == (sz_b, seq, d_model)
    assert bool(jnp.all(jnp.isfinite(out)))
    assert bool(jnp.all(jnp.isfinite(out_kv)))
    assert bool(jnp.all(jnp.isfinite(out_self)))
    print("KERNEL_OK")
</pallas_src>

<mosaic_0001>
module attributes {stable_mosaic.version = 11 : i64} {
  func.func @kernel(%arg0: i32, %arg1: i32, %arg2: memref<16x32xf32, #tpu.memory_space<vmem>>, %arg3: memref<2x32x16xbf16, #tpu.memory_space<vmem>>, %arg4: memref<2x16x16xbf16, #tpu.memory_space<vmem>>, %arg5: memref<2x16x16xf32, #tpu.memory_space<vmem>>) attributes {dimension_semantics = [#tpu.dimension_semantics<parallel>, #tpu.dimension_semantics<arbitrary>], iteration_bounds = array<i64: 1, 1>, scalar_prefetch = 0 : i64, scratch_operands = 1 : i64, tpu.core_type = #tpu.core_type<tc>, window_params = [{transform_indices = @transform_0, window_bounds = array<i64: 16, 32>}, {transform_indices = @transform_1, window_bounds = array<i64: 2, 32, 16>}, {transform_indices = @transform_2, window_bounds = array<i64: 2, 16, 16>}]} {
    %c0_i32 = arith.constant 0 : i32
    %0 = arith.cmpi eq, %arg1, %c0_i32 : i32
    %1 = arith.extui %0 : i1 to i32
    %c0_i32_0 = arith.constant 0 : i32
    %2 = arith.cmpi ne, %1, %c0_i32_0 : i32
    scf.if %2 {
      %cst_22 = arith.constant 0.000000e+00 : f32
      %26 = vector.broadcast %cst_22 : f32 to vector<2x16x16xf32>
      %c0_23 = arith.constant 0 : index
      %c0_24 = arith.constant 0 : index
      %c0_25 = arith.constant 0 : index
      %27 = vector.load %arg5[%c0_23, %c0_24, %c0_25] : memref<2x16x16xf32, #tpu.memory_space<vmem>>, vector<2x16x16xf32>
      tpu.vector_store %arg5[%c0_23, %c0_24, %c0_25], %26 {strides = array<i32>} : memref<2x16x16xf32, #tpu.memory_space<vmem>>, vector<2x16x16xf32>,
    } else {
    }
    %c0 = arith.constant 0 : index
    %c0_1 = arith.constant 0 : index
    %3 = vector.load %arg2[%c0, %c0_1] : memref<16x32xf32, #tpu.memory_space<vmem>>, vector<16x32xf32>
    %4 = arith.truncf %3 : vector<16x32xf32> to vector<16x32xbf16>
    %c0_2 = arith.constant 0 : index
    %c0_3 = arith.constant 0 : index
    %c0_4 = arith.constant 0 : index
    %5 = vector.load %arg5[%c0_2, %c0_3, %c0_4] : memref<2x16x16xf32, #tpu.memory_space<vmem>>, vector<1x16x16xf32>
    %6 = vector.shape_cast %5 : vector<1x16x16xf32> to vector<16x16xf32>
    %c0_5 = arith.constant 0 : index
    %c0_6 = arith.constant 0 : index
    %c0_7 = arith.constant 0 : index
    %7 = vector.load %arg3[%c0_5, %c0_6, %c0_7] : memref<2x32x16xbf16, #tpu.memory_space<vmem>>, vector<1x32x16xbf16>
    %8 = vector.shape_cast %7 : vector<1x32x16xbf16> to vector<32x16xbf16>
    %cst = arith.constant dense<0.000000e+00> : vector<16x16xf32>
    %9 = tpu.matmul %4, %8, %cst {dimension_numbers = #tpu.dot_dimension_numbers<[1], [0], [0], [1], [0, 0, 1, 1], [], []>} : vector<16x32xbf16>, vector<32x16xbf16>, vector<16x16xf32> -> vector<16x16xf32>
    %10 = arith.addf %6, %9 : vector<16x16xf32>
    %c0_8 = arith.constant 0 : index
    %c0_9 = arith.constant 0 : index
    %c0_10 = arith.constant 0 : index
    %11 = vector.load %arg5[%c0_8, %c0_9, %c0_10] : memref<2x16x16xf32, #tpu.memory_space<vmem>>, vector<1x16x16xf32>
    %12 = vector.shape_cast %11 : vector<1x16x16xf32> to vector<16x16xf32>
    %13 = vector.shape_cast %10 : vector<16x16xf32> to vector<1x16x16xf32>
    tpu.vector_store %arg5[%c0_8, %c0_9, %c0_10], %13 {strides = array<i32>} : memref<2x16x16xf32, #tpu.memory_space<vmem>>, vector<1x16x16xf32>,
    %c1 = arith.constant 1 : index
    %c0_11 = arith.constant 0 : index
    %c0_12 = arith.constant 0 : index
    %14 = vector.load %arg5[%c1, %c0_11, %c0_12] : memref<2x16x16xf32, #tpu.memory_space<vmem>>, vector<1x16x16xf32>
    %15 = vector.shape_cast %14 : vector<1x16x16xf32> to vector<16x16xf32>
    %c1_13 = arith.constant 1 : index
    %c0_14 = arith.constant 0 : index
    %c0_15 = arith.constant 0 : index
    %16 = vector.load %arg3[%c1_13, %c0_14, %c0_15] : memref<2x32x16xbf16, #tpu.memory_space<vmem>>, vector<1x32x16xbf16>
    %17 = vector.shape_cast %16 : vector<1x32x16xbf16> to vector<32x16xbf16>
    %cst_16 = arith.constant dense<0.000000e+00> : vector<16x16xf32>
    %18 = tpu.matmul %4, %17, %cst_16 {dimension_numbers = #tpu.dot_dimension_numbers<[1], [0], [0], [1], [0, 0, 1, 1], [], []>} : vector<16x32xbf16>, vector<32x16xbf16>, vector<16x16xf32> -> vector<16x16xf32>
    %19 = arith.addf %15, %18 : vector<16x16xf32>
    %c1_17 = arith.constant 1 : index
    %c0_18 = arith.constant 0 : index
    %c0_19 = arith.constant 0 : index
    %20 = vector.load %arg5[%c1_17, %c0_18, %c0_19] : memref<2x16x16xf32, #tpu.memory_space<vmem>>, vector<1x16x16xf32>
    %21 = vector.shape_cast %20 : vector<1x16x16xf32> to vector<16x16xf32>
    %22 = vector.shape_cast %19 : vector<16x16xf32> to vector<1x16x16xf32>
    tpu.vector_store %arg5[%c1_17, %c0_18, %c0_19], %22 {strides = array<i32>} : memref<2x16x16xf32, #tpu.memory_space<vmem>>, vector<1x16x16xf32>,
    %c0_i32_20 = arith.constant 0 : i32
    %23 = arith.cmpi eq, %arg1, %c0_i32_20 : i32
    %24 = arith.extui %23 : i1 to i32
    %c0_i32_21 = arith.constant 0 : i32
    %25 = arith.cmpi ne, %24, %c0_i32_21 : i32
    scf.if %25 {
      %c0_22 = arith.constant 0 : index
      %c0_23 = arith.constant 0 : index
      %c0_24 = arith.constant 0 : index
      %26 = vector.load %arg5[%c0_22, %c0_23, %c0_24] : memref<2x16x16xf32, #tpu.memory_space<vmem>>, vector<2x16x16xf32>
      %27 = arith.truncf %26 : vector<2x16x16xf32> to vector<2x16x16xbf16>
      %c0_25 = arith.constant 0 : index
      %c0_26 = arith.constant 0 : index
      %c0_27 = arith.constant 0 : index
      %28 = vector.load %arg4[%c0_25, %c0_26, %c0_27] : memref<2x16x16xbf16, #tpu.memory_space<vmem>>, vector<2x16x16xbf16>
      tpu.vector_store %arg4[%c0_25, %c0_26, %c0_27], %27 {strides = array<i32>} : memref<2x16x16xbf16, #tpu.memory_space<vmem>>, vector<2x16x16xbf16>,
    } else {
    }
    return
  }
  func.func @transform_0(%arg0: i32, %arg1: i32) -> (i32, i32) {
    %c0_i32 = arith.constant 0 : i32
    return %arg0, %arg1 : i32, i32
  }
  func.func @transform_1(%arg0: i32, %arg1: i32) -> (i32, i32, i32) {
    %c0_i32 = arith.constant 0 : i32
    %c0_i32_0 = arith.constant 0 : i32
    %c0_i32_1 = arith.constant 0 : i32
    return %c0_i32, %arg1, %c0_i32_0 : i32, i32, i32
  }
  func.func @transform_2(%arg0: i32, %arg1: i32) -> (i32, i32, i32) {
    %c0_i32 = arith.constant 0 : i32
    %c0_i32_0 = arith.constant 0 : i32
    %c0_i32_1 = arith.constant 0 : i32
    return %c0_i32, %arg0, %c0_i32_0 : i32, i32, i32
  }
}

</mosaic_0001>

<bundles_post_ra>
// kernel: tpu_custom_call.1
= control target key start
LH: loop header
LB: loop body
LE: loop exit
PB: predicated region body
PF: predicated region fallthrough
CT: control target
= control target key end

     0   :  { %v275_v1 = vmov 0.0   ;;  %vm276_vm0 = vmmov 0   ;;  %vm17_vm1 = vcmask 130048   ;;  %s333_s0 = inlined_call_operand.vmem [shape: f32[16,32], index: 0, kind: input, shape index: {}]   ;;  %s334_s1 = inlined_call_operand.vmem [shape: bf16[2,32,16], index: 1, kind: input, shape index: {}]   ;;  %s335_s2 = inlined_call_operand.hbm [shape: bf16[2,16,16], index: 2, kind: output, shape index: {}]  }
   0x1   :  { %v247_v0 = vld [vmem:[%s334_s1] sm:$0xff]   ;;  %226 = vmatprep.subr.bf16.mxu0 %v275_v1  ;;  %234 = vmatprep.subr.bf16.mxu1 %v275_v1  ;;  %v248_v2 = vld [vmem:[%s334_s1 + $0x10] sm:$0xff]   ;;  %v249_v3 = vld [vmem:[%s334_s1 + $0x8] sm:$0xff]   ;;  %18 = vst.msk [vmem:[#allocation2] sm:$0xff] %vm17_vm1, %v275_v1 }
   0x2   :  { %227 = vmatpush3.bf16.msra.mxu0 %v247_v0  ;;  %230 = vmatprep.mubr.msk.bf16.mxu0 %vm276_vm0, %v275_v1  ;;  %v250_v4 = vld [vmem:[%s334_s1 + $0x18] sm:$0xff]   ;;  %v22_v5 = vld [vmem:[%s333_s0] sm:$0xff]  ;;  %v23_v6 = vld [vmem:[%s333_s0 + $0x8] sm:$0xff]  ;;  %19 = vst.msk [vmem:[#allocation2 + $0x8] sm:$0xff] %vm17_vm1, %v275_v1 }
   0x3   :  { %235 = vmatpush3.bf16.msra.mxu1 %v248_v2  ;;  %228 = vmatprep.subr.bf16.mxu0 %v275_v1  ;;  %20 = vst.msk [vmem:[#allocation2 + $0x10] sm:$0xff] %vm17_vm1, %v275_v1  ;;  %21 = vst.msk [vmem:[#allocation2 + $0x18] sm:$0xff] %vm17_vm1, %v275_v1 }
   0x4   :  { %236 = vmatprep.subr.bf16.mxu1 %v275_v1  ;;  %238 = vmatprep.mubr.msk.bf16.mxu1 %vm276_vm0, %v275_v1 }
   0x5   :  { %7 = vsyncpa [#allocation4], 0  ;;  %v24_v7 = vpack.c.bf16 %v23_v6, %v22_v5  ;;  %vm43_vm2 = vcmask 261120   ;;  %vm181_vm3 = vcmask 125952   ;;  %s277_s0 = smov [#allocation3]  }
   0x6   :  { %229 = vmatpush3.bf16.msra.mxu0 %v249_v3  ;;  %s191_s1 = sshll.u32 %s277_s0, 4  ;;  %s192_s1 = int_to_ptr.vmem [resolvable:$true] %s191_s1 }
   0x7   :  { %237 = vmatpush3.bf16.msra.mxu1 %v250_v4  ;;  %s251_s21 = scalar_lea.vmem %s192_s1, 256  ;;  %p256_p1 = scmp.lt.s32.totalorder %s192_s1, %s192_s1 }
   0x8   :  { %v25_v8 = vld [vmem:[#allocation2] sm:$0xff]  ;;  %p252_p0 = scmp.ne.s32.totalorder %s192_s1, %s251_s21  ;;  %p257_p2 = scmp.lt.s32.totalorder %s251_s21, %s251_s21 }
   0x9   :  { %231 = vmatmul.mubr.msk.bf16.vlgmr.msra.gmra.mrb[0].mxu0 %vm43_vm2, %v24_v7  ;;  %v26_v11 = vld [vmem:[#allocation2 + $0x8] sm:$0xff] }
   0xa   :  { %239 = vmatmul.mubr.msk.bf16.vlgmr.msra.gmra.mrb[0].mxu1 %vm43_vm2, %v24_v7  ;;  %v94_v9 = vld [vmem:[#allocation2 + $0x10] sm:$0xff]  ;;  %v95_v15 = vld [vmem:[#allocation2 + $0x18] sm:$0xff]  ;;  %p258_p3 = por %p257_p2, %p256_p1 }
   0xc   :  { %p259_p4 = pnand %p258_p3, %p252_p0 }
  0xdc   :  { %v81_v10 = vpop.f32.mrb[0].mxu0 }
  0xdd   :  { %v88_v12 = vadd.f32 %v81_v10, %v25_v8  ;;  %v147_v13 = vpop.f32.mrb[0].mxu1  ;;  %v232_v14 = vpop.f32.mrb[1].mxu0 }
  0xde   :  { %v154_v16 = vadd.f32 %v147_v13, %v94_v9  ;;  %v240_v17 = vpop.f32.mrb[1].mxu1  ;;  %v84_v18 = vpop.f32.mrb[2].mxu0 }
  0xdf   :  { %91 = vst.msk [vmem:[#allocation2] sm:$0xff] %vm17_vm1, %v88_v12  ;;  %v89_v19 = vadd.f32 %v84_v18, %v26_v11  ;;  %v150_v20 = vpop.f32.mrb[2].mxu1  ;;  %v233_v21 = vpop.f32.mrb[3].mxu0 }
  0xe0   :  { %156 = vst.msk [vmem:[#allocation2 + $0x10] sm:$0xff] %vm17_vm1, %v154_v16  ;;  %v155_v22 = vadd.f32 %v150_v20, %v95_v15  ;;  %v241_v23 = vpop.f32.mrb[3].mxu1 }
  0xe1   :  { %92 = vst.msk [vmem:[#allocation2 + $0x8] sm:$0xff] %vm17_vm1, %v89_v19 }
  0xe2   :  { %157 = vst.msk [vmem:[#allocation2 + $0x18] sm:$0xff] %vm17_vm1, %v155_v22 }
  0xe6   :  { %v161_v24 = vld [vmem:[#allocation2] sm:$0xff] }
  0xe7   :  { %v163_v25 = vld [vmem:[#allocation2 + $0x10] sm:$0xff]  ;;  %v216_v26 = vpack.c.bf16 %v161_v24, %v161_v24 }
  0xe8   :  { %v162_v27 = vld [vmem:[#allocation2 + $0x8] sm:$0xff]  ;;  %v218_v28 = vpack.c.bf16 %v163_v25, %v163_v25 }
  0xe9   :  { %v164_v29 = vld [vmem:[#allocation2 + $0x18] sm:$0xff]  ;;  %v217_v30 = vpack.c.bf16 %v162_v27, %v162_v27  ;;  %182 = vst.msk [vmem:[#allocation3] sm:$0xf] %vm181_vm3, %v216_v26 }
  0xea   :  { %v219_v31 = vpack.c.bf16 %v164_v29, %v164_v29  ;;  %184 = vst.msk [vmem:[#allocation3 + $0x8] sm:$0xf] %vm181_vm3, %v218_v28 }
  0xeb   :  { %183 = vst.msk [vmem:[#allocation3 + $0x4] sm:$0xf] %vm181_vm3, %v217_v30 }
  0xec   :  { %185 = vst.msk [vmem:[#allocation3 + $0xc] sm:$0xf] %vm181_vm3, %v219_v31 }
  0xed   :  { %262 = shalt.err (!%p259_p4)
}
  0xee   :  { %s263_s24 = scalar_lea.hbm %s335_s2, 256 }
  0xef   :  { %p264_p5 = scmp.ne.s32.totalorder %s335_s2, %s263_s24  ;;  %p267_p6 = scmp.lt.u32.totalorder %s263_s24, %s335_s2 }
  0xf1   :  { %p269_p7 = pnand %p267_p6, %p264_p5 }
  0xf3   :  { %272 = shalt.err (!%p269_p7)
}
  0xf4   :  { %s278_s29 = smov 64   ;;  %s279_s30 = smov 4  }
  0xf5   :  { %197 = dma.vmem_to_hbm [thread:$0]  %s192_s1, 256, %s335_s2, [#allocation4], %s278_s29, %s278_s29, %s279_s30  }
  0xf6   :  { %273 = dma.done.wait [#allocation4], 256  }
  0xf7   :  { %274 = vsyncadd [#allocation4], 4294967040 }
  0xf8   :  { %201 = vsyncpa [#allocation4], 1 }

</bundles_post_ra>
